<compile_context>
chip_gen: v7x
topology: tpu7x:2x2x1
jax: 0.10.0
libtpu: 0.0.40
codegen_flags: <defaults>
</compile_context>

<pallas_src>
import jax
import jax.numpy as jnp
from jax import lax
from jax.experimental import pallas as pl
from jax.experimental.pallas import tpu as pltpu


def _round_up(n, m):
    return ((n + m - 1) // m) * m


# ----------------------------------------------------------------------------
# Pallas kernel: one grid step == T RNN time steps (sequential recurrence).
# ----------------------------------------------------------------------------
def _plc_rnn_kernel(
    pre_ref,    # (T, B, H)  precomputed x @ W_ih0^T + b_ih0 + b_hh0
    w_hh0_ref,  # (H, H)     layer-0 recurrent weights (pre-transposed)
    w1_ref,     # (2H, H)    fused layer-1 weights [W_ih1^T ; W_hh1^T]
    b1_ref,     # (1, H)     b_ih1 + b_hh1
    h_out_ref,  # (T, B, H)  per-step layer-1 hidden state (kernel output)
    h0_ref,     # VMEM scratch (B, H): layer-0 hidden state (carried over chunks)
    h1_ref,     # VMEM scratch (B, H): layer-1 hidden state (carried over chunks)
):
    T, B, H = pre_ref.shape

    # h0 = zeros(num_layers, B, H) in the PyTorch forward.
    @pl.when(pl.program_id(0) == 0)
    def _():
        h0_ref[...] = jnp.zeros_like(h0_ref)
        h1_ref[...] = jnp.zeros_like(h1_ref)

    w_hh0 = w_hh0_ref[...]
    w1 = w1_ref[...]
    # Hoist the sublane broadcast of the bias out of the time loop.
    b1 = jnp.broadcast_to(b1_ref[...], (B, H))

    def step(t, carry):
        h0, h1 = carry
        pre_t = pre_ref[t]  # (B, H)
        # Layer 0: h0 = tanh(pre_t + h0 @ W_hh0^T)   (input proj + biases hoisted)
        h0n = jnp.tanh(
            pre_t + jnp.dot(h0, w_hh0, preferred_element_type=jnp.float32)
        )
        # Layer 1 (fused): h1 = tanh([h0n, h1] @ [W_ih1^T; W_hh1^T] + b1)
        lhs = jnp.concatenate([h0n, h1], axis=-1)  # (B, 2H)
        h1n = jnp.tanh(
            jnp.dot(lhs, w1, preferred_element_type=jnp.float32) + b1
        )
        h_out_ref[t] = h1n.astype(h_out_ref.dtype)
        return (h0n, h1n)

    unroll = True if T <= 16 else 8
    h0, h1 = lax.fori_loop(0, T, step, (h0_ref[...], h1_ref[...]), unroll=unroll)
    h0_ref[...] = h0
    h1_ref[...] = h1


# ----------------------------------------------------------------------------
# Wrapper
# ----------------------------------------------------------------------------
def plc_model_forward(x, params, *, max_chunk=64):
    """x: (B, S, F) float32  ->  (B, S, 1) float32 (PyTorch batch_first)."""
    B, S, F = x.shape
    H = params["w_hh0"].shape[0]

    # ---- batch / time padding for dense tiles and whole chunks ----
    B_pad = _round_up(B, 8)                 # f32 sublane multiple
    T = max(1, min(max_chunk, S))           # time-chunk size
    S_pad = _round_up(S, T)

    x_p = jnp.zeros((B_pad, S_pad, F), jnp.float32).at[:B, :S, :].set(x)

    # ---- work hoisted out of the sequential recurrence (plain XLA) ----
    x_tm = jnp.transpose(x_p, (1, 0, 2))                               # (S_pad, B_pad, F)
    pre = (x_tm @ params["w_ih0"].T
           + (params["b_ih0"] + params["b_hh0"])).astype(jnp.float32)  # (S_pad, B_pad, H)

    w_hh0_t = params["w_hh0"].T.astype(jnp.float32)                    # (H, H)
    w1 = jnp.concatenate(
        [params["w_ih1"].T, params["w_hh1"].T], axis=0
    ).astype(jnp.float32)                                              # (2H, H)
    b1 = (params["b_ih1"] + params["b_hh1"]).reshape(1, H).astype(jnp.float32)

    const = lambda c: (0, 0)                                           # weights: same block every chunk

    h_tm = pl.pallas_call(
        _plc_rnn_kernel,
        out_shape=jax.ShapeDtypeStruct((S_pad, B_pad, H), jnp.float32),
        grid_spec=pltpu.PrefetchScalarGridSpec(
            num_scalar_prefetch=0,
            grid=(S_pad // T,),
            in_specs=[
                pl.BlockSpec((T, B_pad, H), lambda c: (c, 0, 0)),      # pre-activations stream
                pl.BlockSpec((H, H), const),                           # W_hh0^T
                pl.BlockSpec((2 * H, H), const),                       # fused layer-1 weights
                pl.BlockSpec((1, H), const),                           # b1
            ],
            out_specs=pl.BlockSpec((T, B_pad, H), lambda c: (c, 0, 0)),  # lane-dense h1 stream
            scratch_shapes=[
                pltpu.VMEM((B_pad, H), jnp.float32),                   # layer-0 hidden state
                pltpu.VMEM((B_pad, H), jnp.float32),                   # layer-1 hidden state
            ],
        ),
        compiler_params=pltpu.CompilerParams(
            dimension_semantics=("arbitrary",),                        # recurrence: sequential
        ),
    )(pre, w_hh0_t, w1, b1)

    # ---- fc head as one lane-dense matmul outside the recurrence ----
    y_tm = h_tm @ params["fc_w"].T + params["fc_b"]                    # (S_pad, B_pad, 1)
    y = jnp.transpose(y_tm, (1, 0, 2))[:B, :S, :]                      # (B, S, 1)
    return y


# ----------------------------------------------------------------------------
# Pure-JAX reference (PyTorch nn.RNN semantics) for a correctness check.
# ----------------------------------------------------------------------------
def plc_model_ref(x, p):
    B, S, F = x.shape
    H = p["w_hh0"].shape[0]

    def step(carry, x_t):
        h0, h1 = carry
        h0n = jnp.tanh(x_t @ p["w_ih0"].T + p["b_ih0"] + h0 @ p["w_hh0"].T + p["b_hh0"])
        h1n = jnp.tanh(h0n @ p["w_ih1"].T + p["b_ih1"] + h1 @ p["w_hh1"].T + p["b_hh1"])
        return (h0n, h1n), h1n

    init = (jnp.zeros((B, H), jnp.float32), jnp.zeros((B, H), jnp.float32))
    _, hs = jax.lax.scan(step, init, jnp.transpose(x, (1, 0, 2)))   # (S, B, H)
    out = hs @ p["fc_w"].T + p["fc_b"]                              # (S, B, 1)
    return jnp.transpose(out, (1, 0, 2))


# ----------------------------------------------------------------------------
# Deterministic parameter init (PyTorch shapes; uniform(-1/sqrt(H), 1/sqrt(H))).
# ----------------------------------------------------------------------------
def init_params(key, input_size, hidden_size):
    ks = jax.random.split(key, 10)
    s = 1.0 / jnp.sqrt(hidden_size)
    u = lambda k, shape: jax.random.uniform(k, shape, jnp.float32, -s, s)
    return {
        "w_ih0": u(ks[0], (hidden_size, input_size)),
        "w_hh0": u(ks[1], (hidden_size, hidden_size)),
        "b_ih0": u(ks[2], (hidden_size,)),
        "b_hh0": u(ks[3], (hidden_size,)),
        "w_ih1": u(ks[4], (hidden_size, hidden_size)),
        "w_hh1": u(ks[5], (hidden_size, hidden_size)),
        "b_ih1": u(ks[6], (hidden_size,)),
        "b_hh1": u(ks[7], (hidden_size,)),
        "fc_w":  u(ks[8], (input_size, hidden_size)),
        "fc_b":  u(ks[9], (input_size,)),
    }


if __name__ == "__main__":
    input_size = 1
    hidden_size = 128
    batch = 2
    seq = 8

    key = jax.random.PRNGKey(0)
    k_param, k_x = jax.random.split(key)
    params = init_params(k_param, input_size, hidden_size)
    x = jax.random.normal(k_x, (batch, seq, input_size), jnp.float32)

    fwd = jax.jit(plc_model_forward)
    out = jax.block_until_ready(fwd(x, params))

    ref = jax.block_until_ready(plc_model_ref(x, params))
    assert out.shape == (batch, seq, input_size), out.shape
    assert jnp.allclose(out, ref, atol=1e-4, rtol=1e-4), "mismatch vs reference"

    print("KERNEL_OK")
</pallas_src>

<mosaic_0001>
module attributes {stable_mosaic.version = 11 : i64} {
  func.func @_plc_rnn_kernel(%arg0: i32, %arg1: memref<8x8x128xf32, #tpu.memory_space<vmem>>, %arg2: memref<128x128xf32, #tpu.memory_space<vmem>>, %arg3: memref<256x128xf32, #tpu.memory_space<vmem>>, %arg4: memref<1x128xf32, #tpu.memory_space<vmem>>, %arg5: memref<8x8x128xf32, #tpu.memory_space<vmem>>, %arg6: memref<8x128xf32, #tpu.memory_space<vmem>>, %arg7: memref<8x128xf32, #tpu.memory_space<vmem>>) attributes {dimension_semantics = [#tpu.dimension_semantics<arbitrary>], iteration_bounds = array<i64: 1>, scalar_prefetch = 0 : i64, scratch_operands = 2 : i64, tpu.core_type = #tpu.core_type<tc>, window_params = [{transform_indices = @transform_0, window_bounds = array<i64: 8, 8, 128>}, {pipeline_mode = #tpu.pipeline_mode<synchronous>, transform_indices = @transform_1, window_bounds = array<i64: 128, 128>}, {pipeline_mode = #tpu.pipeline_mode<synchronous>, transform_indices = @transform_2, window_bounds = array<i64: 256, 128>}, {pipeline_mode = #tpu.pipeline_mode<synchronous>, transform_indices = @transform_3, window_bounds = array<i64: 1, 128>}, {transform_indices = @transform_4, window_bounds = array<i64: 8, 8, 128>}]} {
    %c0_i32 = arith.constant 0 : i32
    %0 = arith.cmpi eq, %arg0, %c0_i32 : i32
    %1 = arith.extui %0 : i1 to i32
    %c0_i32_0 = arith.constant 0 : i32
    %2 = arith.cmpi ne, %1, %c0_i32_0 : i32
    scf.if %2 {
      %cst_62 = arith.constant 0.000000e+00 : f32
      %124 = vector.broadcast %cst_62 : f32 to vector<8x128xf32>
      %c0_63 = arith.constant 0 : index
      %c0_64 = arith.constant 0 : index
      %125 = vector.load %arg6[%c0_63, %c0_64] : memref<8x128xf32, #tpu.memory_space<vmem>>, vector<8x128xf32>
      tpu.vector_store %arg6[%c0_63, %c0_64], %124 {strides = array<i32>} : memref<8x128xf32, #tpu.memory_space<vmem>>, vector<8x128xf32>,
      %cst_65 = arith.constant 0.000000e+00 : f32
      %126 = vector.broadcast %cst_65 : f32 to vector<8x128xf32>
      %c0_66 = arith.constant 0 : index
      %c0_67 = arith.constant 0 : index
      %127 = vector.load %arg7[%c0_66, %c0_67] : memref<8x128xf32, #tpu.memory_space<vmem>>, vector<8x128xf32>
      tpu.vector_store %arg7[%c0_66, %c0_67], %126 {strides = array<i32>} : memref<8x128xf32, #tpu.memory_space<vmem>>, vector<8x128xf32>,
    } else {
    }
    %c0 = arith.constant 0 : index
    %c0_1 = arith.constant 0 : index
    %3 = vector.load %arg2[%c0, %c0_1] : memref<128x128xf32, #tpu.memory_space<vmem>>, vector<128x128xf32>
    %c0_2 = arith.constant 0 : index
    %c0_3 = arith.constant 0 : index
    %4 = vector.load %arg3[%c0_2, %c0_3] : memref<256x128xf32, #tpu.memory_space<vmem>>, vector<256x128xf32>
    %c0_4 = arith.constant 0 : index
    %c0_5 = arith.constant 0 : index
    %5 = vector.load %arg4[%c0_4, %c0_5] : memref<1x128xf32, #tpu.memory_space<vmem>>, vector<1x128xf32>
    %6 = vector.shape_cast %5 : vector<1x128xf32> to vector<1x128xf32>
    %7 = vector.broadcast %6 : vector<1x128xf32> to vector<8x128xf32>
    %c0_6 = arith.constant 0 : index
    %c0_7 = arith.constant 0 : index
    %8 = vector.load %arg6[%c0_6, %c0_7] : memref<8x128xf32, #tpu.memory_space<vmem>>, vector<8x128xf32>
    %c0_8 = arith.constant 0 : index
    %c0_9 = arith.constant 0 : index
    %9 = vector.load %arg7[%c0_8, %c0_9] : memref<8x128xf32, #tpu.memory_space<vmem>>, vector<8x128xf32>
    %c0_i32_10 = arith.constant 0 : i32
    %10 = arith.index_cast %c0_i32_10 : i32 to index
    %c0_11 = arith.constant 0 : index
    %c0_12 = arith.constant 0 : index
    %11 = vector.load %arg1[%10, %c0_11, %c0_12] : memref<8x8x128xf32, #tpu.memory_space<vmem>>, vector<1x8x128xf32>
    %12 = vector.shape_cast %11 : vector<1x8x128xf32> to vector<8x128xf32>
    %cst = arith.constant dense<0.000000e+00> : vector<8x128xf32>
    %13 = tpu.matmul %8, %3, %cst {dimension_numbers = #tpu.dot_dimension_numbers<[1], [0], [0], [1], [0, 0, 1, 1], [], []>} : vector<8x128xf32>, vector<128x128xf32>, vector<8x128xf32> -> vector<8x128xf32>
    %14 = arith.addf %12, %13 : vector<8x128xf32>
    %15 = math.tanh %14 : vector<8x128xf32>
    %16 = tpu.concatenate %15, %9 in 1 : vector<8x128xf32>, vector<8x128xf32> -> vector<8x256xf32>
    %cst_13 = arith.constant dense<0.000000e+00> : vector<8x128xf32>
    %17 = tpu.matmul %16, %4, %cst_13 {dimension_numbers = #tpu.dot_dimension_numbers<[1], [0], [0], [1], [0, 0, 1, 1], [], []>} : vector<8x256xf32>, vector<256x128xf32>, vector<8x128xf32> -> vector<8x128xf32>
    %18 = arith.addf %17, %7 : vector<8x128xf32>
    %19 = math.tanh %18 : vector<8x128xf32>
    %20 = arith.index_cast %c0_i32_10 : i32 to index
    %c0_14 = arith.constant 0 : index
    %c0_15 = arith.constant 0 : index
    %21 = vector.load %arg5[%20, %c0_14, %c0_15] : memref<8x8x128xf32, #tpu.memory_space<vmem>>, vector<1x8x128xf32>
    %22 = vector.shape_cast %21 : vector<1x8x128xf32> to vector<8x128xf32>
    %23 = vector.shape_cast %19 : vector<8x128xf32> to vector<1x8x128xf32>
    tpu.vector_store %arg5[%20, %c0_14, %c0_15], %23 {strides = array<i32>} : memref<8x8x128xf32, #tpu.memory_space<vmem>>, vector<1x8x128xf32>,
    %c1_i32 = arith.constant 1 : i32
    %24 = arith.index_cast %c1_i32 : i32 to index
    %c0_16 = arith.constant 0 : index
    %c0_17 = arith.constant 0 : index
    %25 = vector.load %arg1[%24, %c0_16, %c0_17] : memref<8x8x128xf32, #tpu.memory_space<vmem>>, vector<1x8x128xf32>
    %26 = vector.shape_cast %25 : vector<1x8x128xf32> to vector<8x128xf32>
    %cst_18 = arith.constant dense<0.000000e+00> : vector<8x128xf32>
    %27 = tpu.matmul %15, %3, %cst_18 {dimension_numbers = #tpu.dot_dimension_numbers<[1], [0], [0], [1], [0, 0, 1, 1], [], []>} : vector<8x128xf32>, vector<128x128xf32>, vector<8x128xf32> -> vector<8x128xf32>
    %28 = arith.addf %26, %27 : vector<8x128xf32>
    %29 = math.tanh %28 : vector<8x128xf32>
    %30 = tpu.concatenate %29, %19 in 1 : vector<8x128xf32>, vector<8x128xf32> -> vector<8x256xf32>
    %cst_19 = arith.constant dense<0.000000e+00> : vector<8x128xf32>
    %31 = tpu.matmul %30, %4, %cst_19 {dimension_numbers = #tpu.dot_dimension_numbers<[1], [0], [0], [1], [0, 0, 1, 1], [], []>} : vector<8x256xf32>, vector<256x128xf32>, vector<8x128xf32> -> vector<8x128xf32>
    %32 = arith.addf %31, %7 : vector<8x128xf32>
    %33 = math.tanh %32 : vector<8x128xf32>
    %34 = arith.index_cast %c1_i32 : i32 to index
    %c0_20 = arith.constant 0 : index
    %c0_21 = arith.constant 0 : index
    %35 = vector.load %arg5[%34, %c0_20, %c0_21] : memref<8x8x128xf32, #tpu.memory_space<vmem>>, vector<1x8x128xf32>
    %36 = vector.shape_cast %35 : vector<1x8x128xf32> to vector<8x128xf32>
    %37 = vector.shape_cast %33 : vector<8x128xf32> to vector<1x8x128xf32>
    tpu.vector_store %arg5[%34, %c0_20, %c0_21], %37 {strides = array<i32>} : memref<8x8x128xf32, #tpu.memory_space<vmem>>, vector<1x8x128xf32>,
    %c2_i32 = arith.constant 2 : i32
    %38 = arith.index_cast %c2_i32 : i32 to index
    %c0_22 = arith.constant 0 : index
    %c0_23 = arith.constant 0 : index
    %39 = vector.load %arg1[%38, %c0_22, %c0_23] : memref<8x8x128xf32, #tpu.memory_space<vmem>>, vector<1x8x128xf32>
    %40 = vector.shape_cast %39 : vector<1x8x128xf32> to vector<8x128xf32>
    %cst_24 = arith.constant dense<0.000000e+00> : vector<8x128xf32>
    %41 = tpu.matmul %29, %3, %cst_24 {dimension_numbers = #tpu.dot_dimension_numbers<[1], [0], [0], [1], [0, 0, 1, 1], [], []>} : vector<8x128xf32>, vector<128x128xf32>, vector<8x128xf32> -> vector<8x128xf32>
    %42 = arith.addf %40, %41 : vector<8x128xf32>
    %43 = math.tanh %42 : vector<8x128xf32>
    %44 = tpu.concatenate %43, %33 in 1 : vector<8x128xf32>, vector<8x128xf32> -> vector<8x256xf32>
    %cst_25 = arith.constant dense<0.000000e+00> : vector<8x128xf32>
    %45 = tpu.matmul %44, %4, %cst_25 {dimension_numbers = #tpu.dot_dimension_numbers<[1], [0], [0], [1], [0, 0, 1, 1], [], []>} : vector<8x256xf32>, vector<256x128xf32>, vector<8x128xf32> -> vector<8x128xf32>
    %46 = arith.addf %45, %7 : vector<8x128xf32>
    %47 = math.tanh %46 : vector<8x128xf32>
    %48 = arith.index_cast %c2_i32 : i32 to index
    %c0_26 = arith.constant 0 : index
    %c0_27 = arith.constant 0 : index
    %49 = vector.load %arg5[%48, %c0_26, %c0_27] : memref<8x8x128xf32, #tpu.memory_space<vmem>>, vector<1x8x128xf32>
    %50 = vector.shape_cast %49 : vector<1x8x128xf32> to vector<8x128xf32>
    %51 = vector.shape_cast %47 : vector<8x128xf32> to vector<1x8x128xf32>
    tpu.vector_store %arg5[%48, %c0_26, %c0_27], %51 {strides = array<i32>} : memref<8x8x128xf32, #tpu.memory_space<vmem>>, vector<1x8x128xf32>,
    %c3_i32 = arith.constant 3 : i32
    %52 = arith.index_cast %c3_i32 : i32 to index
    %c0_28 = arith.constant 0 : index
    %c0_29 = arith.constant 0 : index
    %53 = vector.load %arg1[%52, %c0_28, %c0_29] : memref<8x8x128xf32, #tpu.memory_space<vmem>>, vector<1x8x128xf32>
    %54 = vector.shape_cast %53 : vector<1x8x128xf32> to vector<8x128xf32>
    %cst_30 = arith.constant dense<0.000000e+00> : vector<8x128xf32>
    %55 = tpu.matmul %43, %3, %cst_30 {dimension_numbers = #tpu.dot_dimension_numbers<[1], [0], [0], [1], [0, 0, 1, 1], [], []>} : vector<8x128xf32>, vector<128x128xf32>, vector<8x128xf32> -> vector<8x128xf32>
    %56 = arith.addf %54, %55 : vector<8x128xf32>
    %57 = math.tanh %56 : vector<8x128xf32>
    %58 = tpu.concatenate %57, %47 in 1 : vector<8x128xf32>, vector<8x128xf32> -> vector<8x256xf32>
    %cst_31 = arith.constant dense<0.000000e+00> : vector<8x128xf32>
    %59 = tpu.matmul %58, %4, %cst_31 {dimension_numbers = #tpu.dot_dimension_numbers<[1], [0], [0], [1], [0, 0, 1, 1], [], []>} : vector<8x256xf32>, vector<256x128xf32>, vector<8x128xf32> -> vector<8x128xf32>
    %60 = arith.addf %59, %7 : vector<8x128xf32>
    %61 = math.tanh %60 : vector<8x128xf32>
    %62 = arith.index_cast %c3_i32 : i32 to index
    %c0_32 = arith.constant 0 : index
    %c0_33 = arith.constant 0 : index
    %63 = vector.load %arg5[%62, %c0_32, %c0_33] : memref<8x8x128xf32, #tpu.memory_space<vmem>>, vector<1x8x128xf32>
    %64 = vector.shape_cast %63 : vector<1x8x128xf32> to vector<8x128xf32>
    %65 = vector.shape_cast %61 : vector<8x128xf32> to vector<1x8x128xf32>
    tpu.vector_store %arg5[%62, %c0_32, %c0_33], %65 {strides = array<i32>} : memref<8x8x128xf32, #tpu.memory_space<vmem>>, vector<1x8x128xf32>,
    %c4_i32 = arith.constant 4 : i32
    %66 = arith.index_cast %c4_i32 : i32 to index
    %c0_34 = arith.constant 0 : index
    %c0_35 = arith.constant 0 : index
    %67 = vector.load %arg1[%66, %c0_34, %c0_35] : memref<8x8x128xf32, #tpu.memory_space<vmem>>, vector<1x8x128xf32>
    %68 = vector.shape_cast %67 : vector<1x8x128xf32> to vector<8x128xf32>
    %cst_36 = arith.constant dense<0.000000e+00> : vector<8x128xf32>
    %69 = tpu.matmul %57, %3, %cst_36 {dimension_numbers = #tpu.dot_dimension_numbers<[1], [0], [0], [1], [0, 0, 1, 1], [], []>} : vector<8x128xf32>, vector<128x128xf32>, vector<8x128xf32> -> vector<8x128xf32>
    %70 = arith.addf %68, %69 : vector<8x128xf32>
    %71 = math.tanh %70 : vector<8x128xf32>
    %72 = tpu.concatenate %71, %61 in 1 : vector<8x128xf32>, vector<8x128xf32> -> vector<8x256xf32>
    %cst_37 = arith.constant dense<0.000000e+00> : vector<8x128xf32>
    %73 = tpu.matmul %72, %4, %cst_37 {dimension_numbers = #tpu.dot_dimension_numbers<[1], [0], [0], [1], [0, 0, 1, 1], [], []>} : vector<8x256xf32>, vector<256x128xf32>, vector<8x128xf32> -> vector<8x128xf32>
    %74 = arith.addf %73, %7 : vector<8x128xf32>
    %75 = math.tanh %74 : vector<8x128xf32>
    %76 = arith.index_cast %c4_i32 : i32 to index
    %c0_38 = arith.constant 0 : index
    %c0_39 = arith.constant 0 : index
    %77 = vector.load %arg5[%76, %c0_38, %c0_39] : memref<8x8x128xf32, #tpu.memory_space<vmem>>, vector<1x8x128xf32>
    %78 = vector.shape_cast %77 : vector<1x8x128xf32> to vector<8x128xf32>
    %79 = vector.shape_cast %75 : vector<8x128xf32> to vector<1x8x128xf32>
    tpu.vector_store %arg5[%76, %c0_38, %c0_39], %79 {strides = array<i32>} : memref<8x8x128xf32, #tpu.memory_space<vmem>>, vector<1x8x128xf32>,
    %c5_i32 = arith.constant 5 : i32
    %80 = arith.index_cast %c5_i32 : i32 to index
    %c0_40 = arith.constant 0 : index
    %c0_41 = arith.constant 0 : index
    %81 = vector.load %arg1[%80, %c0_40, %c0_41] : memref<8x8x128xf32, #tpu.memory_space<vmem>>, vector<1x8x128xf32>
    %82 = vector.shape_cast %81 : vector<1x8x128xf32> to vector<8x128xf32>
    %cst_42 = arith.constant dense<0.000000e+00> : vector<8x128xf32>
    %83 = tpu.matmul %71, %3, %cst_42 {dimension_numbers = #tpu.dot_dimension_numbers<[1], [0], [0], [1], [0, 0, 1, 1], [], []>} : vector<8x128xf32>, vector<128x128xf32>, vector<8x128xf32> -> vector<8x128xf32>
    %84 = arith.addf %82, %83 : vector<8x128xf32>
    %85 = math.tanh %84 : vector<8x128xf32>
    %86 = tpu.concatenate %85, %75 in 1 : vector<8x128xf32>, vector<8x128xf32> -> vector<8x256xf32>
    %cst_43 = arith.constant dense<0.000000e+00> : vector<8x128xf32>
    %87 = tpu.matmul %86, %4, %cst_43 {dimension_numbers = #tpu.dot_dimension_numbers<[1], [0], [0], [1], [0, 0, 1, 1], [], []>} : vector<8x256xf32>, vector<256x128xf32>, vector<8x128xf32> -> vector<8x128xf32>
    %88 = arith.addf %87, %7 : vector<8x128xf32>
    %89 = math.tanh %88 : vector<8x128xf32>
    %90 = arith.index_cast %c5_i32 : i32 to index
    %c0_44 = arith.constant 0 : index
    %c0_45 = arith.constant 0 : index
    %91 = vector.load %arg5[%90, %c0_44, %c0_45] : memref<8x8x128xf32, #tpu.memory_space<vmem>>, vector<1x8x128xf32>
    %92 = vector.shape_cast %91 : vector<1x8x128xf32> to vector<8x128xf32>
    %93 = vector.shape_cast %89 : vector<8x128xf32> to vector<1x8x128xf32>
    tpu.vector_store %arg5[%90, %c0_44, %c0_45], %93 {strides = array<i32>} : memref<8x8x128xf32, #tpu.memory_space<vmem>>, vector<1x8x128xf32>,
    %c6_i32 = arith.constant 6 : i32
    %94 = arith.index_cast %c6_i32 : i32 to index
    %c0_46 = arith.constant 0 : index
    %c0_47 = arith.constant 0 : index
    %95 = vector.load %arg1[%94, %c0_46, %c0_47] : memref<8x8x128xf32, #tpu.memory_space<vmem>>, vector<1x8x128xf32>
    %96 = vector.shape_cast %95 : vector<1x8x128xf32> to vector<8x128xf32>
    %cst_48 = arith.constant dense<0.000000e+00> : vector<8x128xf32>
    %97 = tpu.matmul %85, %3, %cst_48 {dimension_numbers = #tpu.dot_dimension_numbers<[1], [0], [0], [1], [0, 0, 1, 1], [], []>} : vector<8x128xf32>, vector<128x128xf32>, vector<8x128xf32> -> vector<8x128xf32>
    %98 = arith.addf %96, %97 : vector<8x128xf32>
    %99 = math.tanh %98 : vector<8x128xf32>
    %100 = tpu.concatenate %99, %89 in 1 : vector<8x128xf32>, vector<8x128xf32> -> vector<8x256xf32>
    %cst_49 = arith.constant dense<0.000000e+00> : vector<8x128xf32>
    %101 = tpu.matmul %100, %4, %cst_49 {dimension_numbers = #tpu.dot_dimension_numbers<[1], [0], [0], [1], [0, 0, 1, 1], [], []>} : vector<8x256xf32>, vector<256x128xf32>, vector<8x128xf32> -> vector<8x128xf32>
    %102 = arith.addf %101, %7 : vector<8x128xf32>
    %103 = math.tanh %102 : vector<8x128xf32>
    %104 = arith.index_cast %c6_i32 : i32 to index
    %c0_50 = arith.constant 0 : index
    %c0_51 = arith.constant 0 : index
    %105 = vector.load %arg5[%104, %c0_50, %c0_51] : memref<8x8x128xf32, #tpu.memory_space<vmem>>, vector<1x8x128xf32>
    %106 = vector.shape_cast %105 : vector<1x8x128xf32> to vector<8x128xf32>
    %107 = vector.shape_cast %103 : vector<8x128xf32> to vector<1x8x128xf32>
    tpu.vector_store %arg5[%104, %c0_50, %c0_51], %107 {strides = array<i32>} : memref<8x8x128xf32, #tpu.memory_space<vmem>>, vector<1x8x128xf32>,
    %c7_i32 = arith.constant 7 : i32
    %108 = arith.index_cast %c7_i32 : i32 to index
    %c0_52 = arith.constant 0 : index
    %c0_53 = arith.constant 0 : index
    %109 = vector.load %arg1[%108, %c0_52, %c0_53] : memref<8x8x128xf32, #tpu.memory_space<vmem>>, vector<1x8x128xf32>
    %110 = vector.shape_cast %109 : vector<1x8x128xf32> to vector<8x128xf32>
    %cst_54 = arith.constant dense<0.000000e+00> : vector<8x128xf32>
    %111 = tpu.matmul %99, %3, %cst_54 {dimension_numbers = #tpu.dot_dimension_numbers<[1], [0], [0], [1], [0, 0, 1, 1], [], []>} : vector<8x128xf32>, vector<128x128xf32>, vector<8x128xf32> -> vector<8x128xf32>
    %112 = arith.addf %110, %111 : vector<8x128xf32>
    %113 = math.tanh %112 : vector<8x128xf32>
    %114 = tpu.concatenate %113, %103 in 1 : vector<8x128xf32>, vector<8x128xf32> -> vector<8x256xf32>
    %cst_55 = arith.constant dense<0.000000e+00> : vector<8x128xf32>
    %115 = tpu.matmul %114, %4, %cst_55 {dimension_numbers = #tpu.dot_dimension_numbers<[1], [0], [0], [1], [0, 0, 1, 1], [], []>} : vector<8x256xf32>, vector<256x128xf32>, vector<8x128xf32> -> vector<8x128xf32>
    %116 = arith.addf %115, %7 : vector<8x128xf32>
    %117 = math.tanh %116 : vector<8x128xf32>
    %118 = arith.index_cast %c7_i32 : i32 to index
    %c0_56 = arith.constant 0 : index
    %c0_57 = arith.constant 0 : index
    %119 = vector.load %arg5[%118, %c0_56, %c0_57] : memref<8x8x128xf32, #tpu.memory_space<vmem>>, vector<1x8x128xf32>
    %120 = vector.shape_cast %119 : vector<1x8x128xf32> to vector<8x128xf32>
    %121 = vector.shape_cast %117 : vector<8x128xf32> to vector<1x8x128xf32>
    tpu.vector_store %arg5[%118, %c0_56, %c0_57], %121 {strides = array<i32>} : memref<8x8x128xf32, #tpu.memory_space<vmem>>, vector<1x8x128xf32>,
    %c8_i32 = arith.constant 8 : i32
    %c0_58 = arith.constant 0 : index
    %c0_59 = arith.constant 0 : index
    %122 = vector.load %arg6[%c0_58, %c0_59] : memref<8x128xf32, #tpu.memory_space<vmem>>, vector<8x128xf32>
    tpu.vector_store %arg6[%c0_58, %c0_59], %113 {strides = array<i32>} : memref<8x128xf32, #tpu.memory_space<vmem>>, vector<8x128xf32>,
    %c0_60 = arith.constant 0 : index
    %c0_61 = arith.constant 0 : index
    %123 = vector.load %arg7[%c0_60, %c0_61] : memref<8x128xf32, #tpu.memory_space<vmem>>, vector<8x128xf32>
    tpu.vector_store %arg7[%c0_60, %c0_61], %117 {strides = array<i32>} : memref<8x128xf32, #tpu.memory_space<vmem>>, vector<8x128xf32>,
    return
  }
  func.func @transform_0(%arg0: i32) -> (i32, i32, i32) {
    %c0_i32 = arith.constant 0 : i32
    %c0_i32_0 = arith.constant 0 : i32
    %c0_i32_1 = arith.constant 0 : i32
    return %arg0, %c0_i32, %c0_i32_0 : i32, i32, i32
  }
  func.func @transform_1(%arg0: i32) -> (i32, i32) {
    %c0_i32 = arith.constant 0 : i32
    %c0_i32_0 = arith.constant 0 : i32
    %c0_i32_1 = arith.constant 0 : i32
    return %c0_i32, %c0_i32_0 : i32, i32
  }
  func.func @transform_2(%arg0: i32) -> (i32, i32) {
    %c0_i32 = arith.constant 0 : i32
    %c0_i32_0 = arith.constant 0 : i32
    %c0_i32_1 = arith.constant 0 : i32
    return %c0_i32, %c0_i32_0 : i32, i32
  }
  func.func @transform_3(%arg0: i32) -> (i32, i32) {
    %c0_i32 = arith.constant 0 : i32
    %c0_i32_0 = arith.constant 0 : i32
    %c0_i32_1 = arith.constant 0 : i32
    return %c0_i32, %c0_i32_0 : i32, i32
  }
  func.func @transform_4(%arg0: i32) -> (i32, i32, i32) {
    %c0_i32 = arith.constant 0 : i32
    %c0_i32_0 = arith.constant 0 : i32
    %c0_i32_1 = arith.constant 0 : i32
    return %arg0, %c0_i32, %c0_i32_0 : i32, i32, i32
  }
}

</mosaic_0001>

<bundles_post_ra>
// kernel: plc_model_forward.1
= control target key start
LH: loop header
LB: loop body
LE: loop exit
PB: predicated region body
PF: predicated region fallthrough
CT: control target
= control target key end

     0   :  { %v2454_v0 = vmov 0.0|0.0   ;;  %vm2455_vm0 = vmmov 0   ;;  %v2456_v4 = vmov 0.0   ;;  %s3009_s1 = inlined_call_operand.vmem [shape: f32[128,128], index: 1, kind: input, shape index: {}]   ;;  %s3010_s2 = inlined_call_operand.vmem [shape: f32[256,128], index: 2, kind: input, shape index: {}]   ;;  %s3011_s0 = inlined_call_operand.vmem [shape: f32[8,8,128], index: 0, kind: input, shape index: {}]   ;;  %s3012_s3 = inlined_call_operand.vmem [shape: f32[1,128], index: 3, kind: input, shape index: {}]   ;;  %s3013_s4 = inlined_call_operand.vmem [shape: f32[8,8,128], index: 4, kind: output, shape index: {}]  }
   0x1   :  { %1971 = vmatprep.subr.bf16.mxu0 %v2454_v0  ;;  %v23_v1 = vld [vmem:[%s3009_s1] sm:$0xff]  ;;  %v24_v2 = vld [vmem:[%s3009_s1 + $0x8] sm:$0xff]  ;;  %v25_v3 = vld [vmem:[%s3009_s1 + $0x10] sm:$0xff]  ;;  %1723 = vmatprep.mubr.msk.f32.mxu0 %vm2455_vm0, %v2456_v4 }
   0x2   :  { %v2494_v5 = vpack.c.bf16 %v24_v2, %v23_v1  ;;  %v26_v6 = vld [vmem:[%s3009_s1 + $0x18] sm:$0xff]  ;;  %217 = vmatprep.mubr.f32.mxu1 %v2456_v4  ;;  %v27_v8 = vld [vmem:[%s3009_s1 + $0x20] sm:$0xff]  ;;  %v28_v9 = vld [vmem:[%s3009_s1 + $0x28] sm:$0xff] }
   0x3   :  { %v2501_v7 = vpack.c.bf16 %v26_v6, %v25_v3  ;;  %v55_v10 = vld [vmem:[%s3010_s2 + $0x80] sm:$0xff]  ;;  %v56_v11 = vld [vmem:[%s3010_s2 + $0x88] sm:$0xff]  ;;  %v29_v12 = vld [vmem:[%s3009_s1 + $0x30] sm:$0xff]  ;;  %v2531_v17 = vpack.c.bf16 %v28_v9, %v27_v8 }
   0x4   :  { %1973 = vmatpush3.bf16.msra.mxu0 %v2494_v5  ;;  %v2519_v13 = vpack.c.bf16 %v56_v11, %v55_v10  ;;  %v39_v14 = vld [vmem:[%s3010_s2] sm:$0xff]  ;;  %v40_v15 = vld [vmem:[%s3010_s2 + $0x8] sm:$0xff]  ;;  %v57_v16 = vld [vmem:[%s3010_s2 + $0x90] sm:$0xff] }
   0x5   :  { %1974 = vmatprep.subr.bf16.mxu0 %v2454_v0  ;;  %v2533_v18 = vpack.c.bf16 %v40_v15, %v39_v14  ;;  %v58_v19 = vld [vmem:[%s3010_s2 + $0x98] sm:$0xff]  ;;  %v41_v20 = vld [vmem:[%s3010_s2 + $0x10] sm:$0xff]  ;;  %v59_v24 = vld [vmem:[%s3010_s2 + $0xa0] sm:$0xff] }
   0x6   :  { %v42_v21 = vld [vmem:[%s3010_s2 + $0x18] sm:$0xff]  ;;  %1996 = vmatprep.subr.bf16.mxu1 %v2519_v13  ;;  %v2549_v23 = vpack.c.bf16 %v58_v19, %v57_v16  ;;  %v60_v25 = vld [vmem:[%s3010_s2 + $0xa8] sm:$0xff]  ;;  %v43_v28 = vld [vmem:[%s3010_s2 + $0x20] sm:$0xff] }
   0x7   :  { %v30_v22 = vld [vmem:[%s3009_s1 + $0x38] sm:$0xff]  ;;  %1998 = vmatpush3.bf16.msra.mxu1 %v2533_v18  ;;  %v2558_v26 = vpack.c.bf16 %v42_v21, %v41_v20  ;;  %v2561_v27 = vpack.c.bf16 %v60_v25, %v59_v24  ;;  %v44_v29 = vld [vmem:[%s3010_s2 + $0x28] sm:$0xff]  ;;  %v61_v31 = vld [vmem:[%s3010_s2 + $0xb0] sm:$0xff] }
   0x8   :  { %1976 = vmatpush3.bf16.msra.mxu0 %v2501_v7  ;;  %2000 = vmatprep.subr.bf16.mxu1 %v2549_v23  ;;  %v2570_v30 = vpack.c.bf16 %v30_v22, %v29_v12  ;;  %v62_v32 = vld [vmem:[%s3010_s2 + $0xb8] sm:$0xff]  ;;  %v31_v33 = vld [vmem:[%s3009_s1 + $0x40] sm:$0xff]  ;;  %v32_v34 = vld [vmem:[%s3009_s1 + $0x48] sm:$0xff]  ;;  %v2586_v35 = vpack.c.bf16 %v44_v29, %v43_v28 }
   0x9   :  { %1977 = vmatprep.subr.bf16.mxu0 %v2454_v0  ;;  %v2589_v36 = vpack.c.bf16 %v62_v32, %v61_v31  ;;  %v45_v37 = vld [vmem:[%s3010_s2 + $0x30] sm:$0xff]  ;;  %v46_v38 = vld [vmem:[%s3010_s2 + $0x38] sm:$0xff]  ;;  %v2598_v39 = vpack.c.bf16 %v32_v34, %v31_v33  ;;  %v63_v40 = vld [vmem:[%s3010_s2 + $0xc0] sm:$0xff] }
   0xa   :  { %v64_v41 = vld [vmem:[%s3010_s2 + $0xc8] sm:$0xff]  ;;  %v33_v42 = vld [vmem:[%s3009_s1 + $0x50] sm:$0xff]  ;;  %v34_v43 = vld [vmem:[%s3009_s1 + $0x58] sm:$0xff]  ;;  %v2614_v44 = vpack.c.bf16 %v46_v38, %v45_v37 }
   0xb   :  { %2002 = vmatpush3.bf16.msra.mxu1 %v2558_v26  ;;  %v2617_v45 = vpack.c.bf16 %v64_v41, %v63_v40  ;;  %v47_v46 = vld [vmem:[%s3010_s2 + $0x40] sm:$0xff]  ;;  %v48_v47 = vld [vmem:[%s3010_s2 + $0x48] sm:$0xff]  ;;  %v2626_v48 = vpack.c.bf16 %v34_v43, %v33_v42  ;;  %v37_v53 = vld [vmem:[%s3009_s1 + $0x70] sm:$0xff] }
   0xc   :  { %1979 = vmatpush3.bf16.msra.mxu0 %v2531_v17  ;;  %2004 = vmatprep.subr.bf16.mxu1 %v2561_v27  ;;  %v35_v49 = vld [vmem:[%s3009_s1 + $0x60] sm:$0xff]  ;;  %v36_v50 = vld [vmem:[%s3009_s1 + $0x68] sm:$0xff]  ;;  %v2636_v51 = vpack.c.bf16 %v48_v47, %v47_v46  ;;  %v38_v54 = vld [vmem:[%s3009_s1 + $0x78] sm:$0xff] }
   0xd   :  { %1980 = vmatprep.subr.bf16.mxu0 %v2454_v0  ;;  %v2640_v52 = vpack.c.bf16 %v36_v50, %v35_v49  ;;  %v2651_v55 = vpack.c.bf16 %v38_v54, %v37_v53  ;;  %v65_v56 = vld [vmem:[%s3010_s2 + $0xd0] sm:$0xff]  ;;  %v66_v57 = vld [vmem:[%s3010_s2 + $0xd8] sm:$0xff]  ;;  %v67_v62 = vld [vmem:[%s3010_s2 + $0xe0] sm:$0xff] }
   0xe   :  { %v2681_v58 = vpack.c.bf16 %v66_v57, %v65_v56  ;;  %v49_v59 = vld [vmem:[%s3010_s2 + $0x50] sm:$0xff]  ;;  %v50_v60 = vld [vmem:[%s3010_s2 + $0x58] sm:$0xff]  ;;  %v68_v63 = vld [vmem:[%s3010_s2 + $0xe8] sm:$0xff] }
   0xf   :  { %2006 = vmatpush3.bf16.msra.mxu1 %v2586_v35  ;;  %v2689_v61 = vpack.c.bf16 %v50_v60, %v49_v59  ;;  %v51_v1 = vld [vmem:[%s3010_s2 + $0x60] sm:$0xff]  ;;  %v2702_v2 = vpack.c.bf16 %v68_v63, %v67_v62  ;;  %v52_v3 = vld [vmem:[%s3010_s2 + $0x68] sm:$0xff]  ;;  %v69_v6 = vld [vmem:[%s3010_s2 + $0xf0] sm:$0xff] }
  0x10   :  { %1982 = vmatpush3.bf16.msra.mxu0 %v2570_v30  ;;  %2008 = vmatprep.subr.bf16.mxu1 %v2589_v36  ;;  %v70_v8 = vld [vmem:[%s3010_s2 + $0xf8] sm:$0xff]  ;;  %v2713_v9 = vpack.c.bf16 %v52_v3, %v51_v1  ;;  %v53_v11 = vld [vmem:[%s3010_s2 + $0x70] sm:$0xff]  ;;  %v80_v15 = vld [vmem:[%s3011_s0] sm:$0xff] }
  0x11   :  { %1983 = vmatprep.subr.bf16.mxu0 %v2454_v0  ;;  %v2715_v10 = vpack.c.bf16 %v70_v8, %v69_v6  ;;  %v54_v12 = vld [vmem:[%s3010_s2 + $0x78] sm:$0xff]  ;;  %v1261_v22 = vld [vmem:[%s3011_s0 + $0x8] sm:$0xff]  ;;  %v2773_v29 = vld [vmem:[%s3012_s3] ss:$0 sm:$0xff] }
  0x12   :  { %v2725_v14 = vpack.c.bf16 %v54_v12, %v53_v11  ;;  %v1263_v40 = vld [vmem:[%s3011_s0 + $0x10] sm:$0xff]  ;;  %v1265_v56 = vld [vmem:[%s3011_s0 + $0x18] sm:$0xff]  ;;  %v1267_v11 = vld [vmem:[%s3011_s0 + $0x20] sm:$0xff] }
  0x13   :  { %2010 = vmatpush3.bf16.msra.mxu1 %v2614_v44 }
  0x14   :  { %1985 = vmatpush3.bf16.msra.mxu0 %v2598_v39  ;;  %2012 = vmatprep.subr.bf16.mxu1 %v2617_v45 }
  0x15   :  { %1986 = vmatprep.subr.bf16.mxu0 %v2454_v0 }
  0x17   :  { %2014 = vmatpush3.bf16.msra.mxu1 %v2636_v51 }
  0x18   :  { %1988 = vmatpush3.bf16.msra.mxu0 %v2626_v48  ;;  %2016 = vmatprep.subr.bf16.mxu1 %v2681_v58 }
  0x19   :  { %1989 = vmatprep.subr.bf16.mxu0 %v2454_v0 }
  0x1b   :  { %2018 = vmatpush3.bf16.msra.mxu1 %v2689_v61 }
  0x1c   :  { %1991 = vmatpush3.bf16.msra.mxu0 %v2640_v52  ;;  %2020 = vmatprep.subr.bf16.mxu1 %v2702_v2 }
  0x1d   :  { %1992 = vmatprep.subr.bf16.mxu0 %v2454_v0 }
  0x1f   :  { %2022 = vmatpush3.bf16.msra.mxu1 %v2713_v9 }
  0x20   :  { %1994 = vmatpush3.bf16.msra.mxu0 %v2651_v55  ;;  %2024 = vmatprep.subr.bf16.mxu1 %v2715_v10 }
  0x21   :  { %2027 = vmatprep.subr.bf16.mxu0 %v2454_v0 }
  0x23   :  { %1724 = vmatmul.mubr.f32.vlgmr.msra.gmra.mrb[0].mxu0 %v2456_v4  ;;  %2026 = vmatpush3.bf16.msra.mxu1 %v2725_v14 }
  0x24   :  { %2029 = vmatpush3.bf16.msra.mxu0 %v2494_v5  ;;  %1758 = vmatprep.mubr.msk.f32.mxu0 %vm2455_vm0, %v2456_v4 }
  0x25   :  { %2030 = vmatprep.subr.bf16.mxu0 %v2454_v0  ;;  %2052 = vmatprep.subr.bf16.mxu1 %v2519_v13 }
  0x28   :  { %2032 = vmatpush3.bf16.msra.mxu0 %v2501_v7 }
  0x29   :  { %2033 = vmatprep.subr.bf16.mxu0 %v2454_v0 }
  0x2c   :  { %2035 = vmatpush3.bf16.msra.mxu0 %v2531_v17 }
  0x2d   :  { %2036 = vmatprep.subr.bf16.mxu0 %v2454_v0 }
  0x30   :  { %2038 = vmatpush3.bf16.msra.mxu0 %v2570_v30 }
  0x31   :  { %2039 = vmatprep.subr.bf16.mxu0 %v2454_v0 }
  0x34   :  { %2041 = vmatpush3.bf16.msra.mxu0 %v2598_v39 }
  0x35   :  { %2042 = vmatprep.subr.bf16.mxu0 %v2454_v0 }
  0x38   :  { %2044 = vmatpush3.bf16.msra.mxu0 %v2626_v48 }
  0x39   :  { %2045 = vmatprep.subr.bf16.mxu0 %v2454_v0 }
  0x3c   :  { %2047 = vmatpush3.bf16.msra.mxu0 %v2640_v52 }
  0x3d   :  { %2048 = vmatprep.subr.bf16.mxu0 %v2454_v0 }
  0x40   :  { %2050 = vmatpush3.bf16.msra.mxu0 %v2651_v55 }
  0x41   :  { %2083 = vmatprep.subr.bf16.mxu0 %v2454_v0 }
  0xf6   :  { %v147_v16 = vpop.f32.mrb[0].mxu0 }
  0xf7   :  { %v151_v19 = vadd.f32 %v147_v16, %v80_v15  ;;  %v1725_v20 = vpop.f32.mrb[1].mxu0 }
  0xf9   :  { %2422 = vtanh.f32 %v151_v19 }
 0x103   :  { %v2423_v21 = vpop.eup %2422 }
 0x104   :  { %218 = vmatmul.mubr.f32.vlgmr.msra.gmra.mrb[0].mxu1 %v2423_v21  ;;  %1759 = vmatmul.mubr.f32.vlgmr.msra.gmra.mrb[2].mxu0 %v2423_v21 }
 0x105   :  { %2085 = vmatpush3.bf16.msra.mxu0 %v2494_v5  ;;  %2054 = vmatpush3.bf16.msra.mxu1 %v2533_v18 }
 0x106   :  { %2086 = vmatprep.subr.bf16.mxu0 %v2454_v0  ;;  %2056 = vmatprep.subr.bf16.mxu1 %v2549_v23 }
 0x107   :  { %1793 = vmatprep.mubr.msk.f32.mxu0 %vm2455_vm0, %v2456_v4 }
 0x109   :  { %2088 = vmatpush3.bf16.msra.mxu0 %v2501_v7  ;;  %2058 = vmatpush3.bf16.msra.mxu1 %v2558_v26 }
 0x10a   :  { %2089 = vmatprep.subr.bf16.mxu0 %v2454_v0  ;;  %2060 = vmatprep.subr.bf16.mxu1 %v2561_v27 }
 0x10d   :  { %2091 = vmatpush3.bf16.msra.mxu0 %v2531_v17  ;;  %2062 = vmatpush3.bf16.msra.mxu1 %v2586_v35 }
 0x10e   :  { %2092 = vmatprep.subr.bf16.mxu0 %v2454_v0  ;;  %2064 = vmatprep.subr.bf16.mxu1 %v2589_v36 }
 0x111   :  { %2094 = vmatpush3.bf16.msra.mxu0 %v2570_v30  ;;  %2066 = vmatpush3.bf16.msra.mxu1 %v2614_v44 }
 0x112   :  { %2095 = vmatprep.subr.bf16.mxu0 %v2454_v0  ;;  %2068 = vmatprep.subr.bf16.mxu1 %v2617_v45 }
 0x115   :  { %2097 = vmatpush3.bf16.msra.mxu0 %v2598_v39  ;;  %2070 = vmatpush3.bf16.msra.mxu1 %v2636_v51 }
 0x116   :  { %2098 = vmatprep.subr.bf16.mxu0 %v2454_v0  ;;  %2072 = vmatprep.subr.bf16.mxu1 %v2681_v58 }
 0x119   :  { %2100 = vmatpush3.bf16.msra.mxu0 %v2626_v48  ;;  %2074 = vmatpush3.bf16.msra.mxu1 %v2689_v61 }
 0x11a   :  { %2101 = vmatprep.subr.bf16.mxu0 %v2454_v0  ;;  %2076 = vmatprep.subr.bf16.mxu1 %v2702_v2 }
 0x11d   :  { %2103 = vmatpush3.bf16.msra.mxu0 %v2640_v52  ;;  %2078 = vmatpush3.bf16.msra.mxu1 %v2713_v9 }
 0x11e   :  { %2104 = vmatprep.subr.bf16.mxu0 %v2454_v0  ;;  %2080 = vmatprep.subr.bf16.mxu1 %v2715_v10 }
 0x121   :  { %2106 = vmatpush3.bf16.msra.mxu0 %v2651_v55  ;;  %2082 = vmatpush3.bf16.msra.mxu1 %v2725_v14 }
 0x122   :  { %2139 = vmatprep.subr.bf16.mxu0 %v2454_v0  ;;  %2108 = vmatprep.subr.bf16.mxu1 %v2519_v13 }
 0x1d7   :  { %v1324_v24 = vpop.f32.mrb[0].mxu1  ;;  %v293_v25 = vpop.f32.mrb[2].mxu0 }
 0x1d8   :  { %v297_v28 = vadd.f32 %v1261_v22, %v293_v25  ;;  %v1325_v31 = vpop.f32.mrb[1].mxu1  ;;  %v1760_v32 = vpop.f32.mrb[3].mxu0 }
 0x1d9   :  { %v1326_v33 = vadd.f32 %v1325_v31, %v1324_v24 }
 0x1da   :  { %2424 = vtanh.f32 %v297_v28  ;;  %v1269_v28 = vld [vmem:[%s3011_s0 + $0x28] sm:$0xff] }
 0x1db   :  { %v220_v34 = vadd.f32 %v1326_v33, %v2773_v29 }
 0x1dd   :  { %2426 = vtanh.f32 %v220_v34 }
 0x1e4   :  { %v2425_v37 = vpop.eup %2424 }
 0x1e5   :  { %1794 = vmatmul.mubr.f32.vlgmr.msra.gmra.mrb[4].mxu0 %v2425_v37 }
 0x1e6   :  { %2141 = vmatpush3.bf16.msra.mxu0 %v2494_v5  ;;  %1828 = vmatprep.mubr.msk.f32.mxu0 %vm2455_vm0, %v2456_v4 }
 0x1e7   :  { %v2427_v38 = vpop.eup %2426  ;;  %2142 = vmatprep.subr.bf16.mxu0 %v2454_v0 }
 0x1e8   :  { %224 = vst [vmem:[%s3013_s4] sm:$0xff] %v2427_v38  ;;  %363 = vmatprep.mubr.f32.mxu1 %v2427_v38 }
 0x1e9   :  { %364 = vmatmul.mubr.f32.vlgmr.msra.gmra.mrb[2].mxu1 %v2425_v37 }
 0x1ea   :  { %2144 = vmatpush3.bf16.msra.mxu0 %v2501_v7  ;;  %2110 = vmatpush3.bf16.msra.mxu1 %v2533_v18 }
 0x1eb   :  { %2145 = vmatprep.subr.bf16.mxu0 %v2454_v0  ;;  %2112 = vmatprep.subr.bf16.mxu1 %v2549_v23 }
 0x1ee   :  { %2147 = vmatpush3.bf16.msra.mxu0 %v2531_v17  ;;  %2114 = vmatpush3.bf16.msra.mxu1 %v2558_v26 }
 0x1ef   :  { %2148 = vmatprep.subr.bf16.mxu0 %v2454_v0  ;;  %2116 = vmatprep.subr.bf16.mxu1 %v2561_v27 }
 0x1f2   :  { %2150 = vmatpush3.bf16.msra.mxu0 %v2570_v30  ;;  %2118 = vmatpush3.bf16.msra.mxu1 %v2586_v35 }
 0x1f3   :  { %2151 = vmatprep.subr.bf16.mxu0 %v2454_v0  ;;  %2120 = vmatprep.subr.bf16.mxu1 %v2589_v36 }
 0x1f6   :  { %2153 = vmatpush3.bf16.msra.mxu0 %v2598_v39  ;;  %2122 = vmatpush3.bf16.msra.mxu1 %v2614_v44 }
 0x1f7   :  { %2154 = vmatprep.subr.bf16.mxu0 %v2454_v0  ;;  %2124 = vmatprep.subr.bf16.mxu1 %v2617_v45 }
 0x1fa   :  { %2156 = vmatpush3.bf16.msra.mxu0 %v2626_v48  ;;  %2126 = vmatpush3.bf16.msra.mxu1 %v2636_v51 }
 0x1fb   :  { %2157 = vmatprep.subr.bf16.mxu0 %v2454_v0  ;;  %2128 = vmatprep.subr.bf16.mxu1 %v2681_v58 }
 0x1fe   :  { %2159 = vmatpush3.bf16.msra.mxu0 %v2640_v52  ;;  %2130 = vmatpush3.bf16.msra.mxu1 %v2689_v61 }
 0x1ff   :  { %2160 = vmatprep.subr.bf16.mxu0 %v2454_v0  ;;  %2132 = vmatprep.subr.bf16.mxu1 %v2702_v2 }
 0x202   :  { %2162 = vmatpush3.bf16.msra.mxu0 %v2651_v55  ;;  %2134 = vmatpush3.bf16.msra.mxu1 %v2713_v9 }
 0x203   :  { %2136 = vmatprep.subr.bf16.mxu1 %v2715_v10  ;;  %2195 = vmatprep.subr.bf16.mxu0 %v2454_v0 }
 0x206   :  { %2138 = vmatpush3.bf16.msra.mxu1 %v2725_v14 }
 0x207   :  { %2164 = vmatprep.subr.bf16.mxu1 %v2519_v13 }
 0x2b8   :  { %v440_v41 = vpop.f32.mrb[4].mxu0 }
 0x2b9   :  { %v444_v42 = vadd.f32 %v1263_v40, %v440_v41  ;;  %v1795_v43 = vpop.f32.mrb[5].mxu0 }
 0x2bb   :  { %2428 = vtanh.f32 %v444_v42 }
 0x2bc   :  { %v1376_v46 = vpop.f32.mrb[2].mxu1 }
 0x2bd   :  { %v1377_v47 = vpop.f32.mrb[3].mxu1 }
 0x2be   :  { %v1378_v49 = vadd.f32 %v1377_v47, %v1376_v46 }
 0x2c0   :  { %v366_v50 = vadd.f32 %v1378_v49, %v2773_v29 }
 0x2c2   :  { %2430 = vtanh.f32 %v366_v50 }
 0x2c5   :  { %v2429_v53 = vpop.eup %2428 }
 0x2c6   :  { %1829 = vmatmul.mubr.f32.vlgmr.msra.gmra.mrb[6].mxu0 %v2429_v53 }
 0x2c7   :  { %2197 = vmatpush3.bf16.msra.mxu0 %v2494_v5  ;;  %1863 = vmatprep.mubr.msk.f32.mxu0 %vm2455_vm0, %v2456_v4 }
 0x2c8   :  { %2198 = vmatprep.subr.bf16.mxu0 %v2454_v0 }
 0x2cb   :  { %2200 = vmatpush3.bf16.msra.mxu0 %v2501_v7 }
 0x2cc   :  { %v2431_v54 = vpop.eup %2430  ;;  %2201 = vmatprep.subr.bf16.mxu0 %v2454_v0 }
 0x2cd   :  { %1262 = vst [vmem:[%s3013_s4 + $0x8] sm:$0xff] %v2431_v54  ;;  %510 = vmatprep.mubr.f32.mxu1 %v2431_v54 }
 0x2ce   :  { %511 = vmatmul.mubr.f32.vlgmr.msra.gmra.mrb[4].mxu1 %v2429_v53 }
 0x2cf   :  { %2203 = vmatpush3.bf16.msra.mxu0 %v2531_v17  ;;  %2166 = vmatpush3.bf16.msra.mxu1 %v2533_v18 }
 0x2d0   :  { %2204 = vmatprep.subr.bf16.mxu0 %v2454_v0  ;;  %2168 = vmatprep.subr.bf16.mxu1 %v2549_v23 }
 0x2d3   :  { %2206 = vmatpush3.bf16.msra.mxu0 %v2570_v30  ;;  %2170 = vmatpush3.bf16.msra.mxu1 %v2558_v26 }
 0x2d4   :  { %2207 = vmatprep.subr.bf16.mxu0 %v2454_v0  ;;  %2172 = vmatprep.subr.bf16.mxu1 %v2561_v27 }
 0x2d7   :  { %2209 = vmatpush3.bf16.msra.mxu0 %v2598_v39  ;;  %2174 = vmatpush3.bf16.msra.mxu1 %v2586_v35 }
 0x2d8   :  { %2210 = vmatprep.subr.bf16.mxu0 %v2454_v0  ;;  %2176 = vmatprep.subr.bf16.mxu1 %v2589_v36 }
 0x2db   :  { %2212 = vmatpush3.bf16.msra.mxu0 %v2626_v48  ;;  %2178 = vmatpush3.bf16.msra.mxu1 %v2614_v44 }
 0x2dc   :  { %2213 = vmatprep.subr.bf16.mxu0 %v2454_v0  ;;  %2180 = vmatprep.subr.bf16.mxu1 %v2617_v45 }
 0x2df   :  { %2215 = vmatpush3.bf16.msra.mxu0 %v2640_v52  ;;  %2182 = vmatpush3.bf16.msra.mxu1 %v2636_v51 }
 0x2e0   :  { %2216 = vmatprep.subr.bf16.mxu0 %v2454_v0  ;;  %2184 = vmatprep.subr.bf16.mxu1 %v2681_v58 }
 0x2e3   :  { %2218 = vmatpush3.bf16.msra.mxu0 %v2651_v55  ;;  %2186 = vmatpush3.bf16.msra.mxu1 %v2689_v61 }
 0x2e4   :  { %2188 = vmatprep.subr.bf16.mxu1 %v2702_v2  ;;  %2251 = vmatprep.subr.bf16.mxu0 %v2454_v0 }
 0x2e7   :  { %2190 = vmatpush3.bf16.msra.mxu1 %v2713_v9 }
 0x2e8   :  { %2192 = vmatprep.subr.bf16.mxu1 %v2715_v10 }
 0x2eb   :  { %2194 = vmatpush3.bf16.msra.mxu1 %v2725_v14 }
 0x2ec   :  { %2220 = vmatprep.subr.bf16.mxu1 %v2519_v13 }
 0x399   :  { %v587_v57 = vpop.f32.mrb[6].mxu0 }
 0x39a   :  { %v591_v59 = vadd.f32 %v1265_v56, %v587_v57  ;;  %v1830_v60 = vpop.f32.mrb[7].mxu0 }
 0x39c   :  { %2432 = vtanh.f32 %v591_v59 }
 0x3a1   :  { %v1428_v62 = vpop.f32.mrb[4].mxu1 }
 0x3a2   :  { %v1429_v63 = vpop.f32.mrb[5].mxu1 }
 0x3a3   :  { %v1430_v1 = vadd.f32 %v1429_v63, %v1428_v62 }
 0x3a5   :  { %v513_v3 = vadd.f32 %v1430_v1, %v2773_v29 }
 0x3a6   :  { %v2433_v6 = vpop.eup %2432 }
 0x3a7   :  { %2434 = vtanh.f32 %v513_v3  ;;  %1864 = vmatmul.mubr.f32.vlgmr.msra.gmra.mrb[8].mxu0 %v2433_v6 }
 0x3a8   :  { %2253 = vmatpush3.bf16.msra.mxu0 %v2494_v5  ;;  %1898 = vmatprep.mubr.msk.f32.mxu0 %vm2455_vm0, %v2456_v4 }
 0x3a9   :  { %2254 = vmatprep.subr.bf16.mxu0 %v2454_v0 }
 0x3ac   :  { %2256 = vmatpush3.bf16.msra.mxu0 %v2501_v7 }
 0x3ad   :  { %2257 = vmatprep.subr.bf16.mxu0 %v2454_v0 }
 0x3b0   :  { %2259 = vmatpush3.bf16.msra.mxu0 %v2531_v17 }
 0x3b1   :  { %v2435_v8 = vpop.eup %2434  ;;  %2260 = vmatprep.subr.bf16.mxu0 %v2454_v0 }
 0x3b2   :  { %1264 = vst [vmem:[%s3013_s4 + $0x10] sm:$0xff] %v2435_v8  ;;  %657 = vmatprep.mubr.f32.mxu1 %v2435_v8 }
 0x3b3   :  { %658 = vmatmul.mubr.f32.vlgmr.msra.gmra.mrb[6].mxu1 %v2433_v6 }
 0x3b4   :  { %2262 = vmatpush3.bf16.msra.mxu0 %v2570_v30  ;;  %2222 = vmatpush3.bf16.msra.mxu1 %v2533_v18 }
 0x3b5   :  { %2263 = vmatprep.subr.bf16.mxu0 %v2454_v0  ;;  %2224 = vmatprep.subr.bf16.mxu1 %v2549_v23 }
 0x3b8   :  { %2265 = vmatpush3.bf16.msra.mxu0 %v2598_v39  ;;  %2226 = vmatpush3.bf16.msra.mxu1 %v2558_v26 }
 0x3b9   :  { %2266 = vmatprep.subr.bf16.mxu0 %v2454_v0  ;;  %2228 = vmatprep.subr.bf16.mxu1 %v2561_v27 }
 0x3bc   :  { %2268 = vmatpush3.bf16.msra.mxu0 %v2626_v48  ;;  %2230 = vmatpush3.bf16.msra.mxu1 %v2586_v35 }
 0x3bd   :  { %2269 = vmatprep.subr.bf16.mxu0 %v2454_v0  ;;  %2232 = vmatprep.subr.bf16.mxu1 %v2589_v36 }
 0x3c0   :  { %2271 = vmatpush3.bf16.msra.mxu0 %v2640_v52  ;;  %2234 = vmatpush3.bf16.msra.mxu1 %v2614_v44 }
 0x3c1   :  { %2272 = vmatprep.subr.bf16.mxu0 %v2454_v0  ;;  %2236 = vmatprep.subr.bf16.mxu1 %v2617_v45 }
 0x3c4   :  { %2274 = vmatpush3.bf16.msra.mxu0 %v2651_v55  ;;  %2238 = vmatpush3.bf16.msra.mxu1 %v2636_v51 }
 0x3c5   :  { %2240 = vmatprep.subr.bf16.mxu1 %v2681_v58  ;;  %2307 = vmatprep.subr.bf16.mxu0 %v2454_v0 }
 0x3c8   :  { %2242 = vmatpush3.bf16.msra.mxu1 %v2689_v61 }
 0x3c9   :  { %2244 = vmatprep.subr.bf16.mxu1 %v2702_v2 }
 0x3cc   :  { %2246 = vmatpush3.bf16.msra.mxu1 %v2713_v9 }
 0x3cd   :  { %2248 = vmatprep.subr.bf16.mxu1 %v2715_v10 }
 0x3d0   :  { %2250 = vmatpush3.bf16.msra.mxu1 %v2725_v14 }
 0x3d1   :  { %2276 = vmatprep.subr.bf16.mxu1 %v2519_v13 }
 0x47a   :  { %v734_v12 = vpop.f32.mrb[8].mxu0 }
 0x47b   :  { %v738_v15 = vadd.f32 %v1267_v11, %v734_v12  ;;  %v1865_v16 = vpop.f32.mrb[9].mxu0 }
 0x47d   :  { %2436 = vtanh.f32 %v738_v15 }
 0x486   :  { %v1480_v19 = vpop.f32.mrb[6].mxu1 }
 0x487   :  { %v2437_v20 = vpop.eup %2436  ;;  %v1481_v21 = vpop.f32.mrb[7].mxu1 }
 0x488   :  { %v1482_v22 = vadd.f32 %v1481_v21, %v1480_v19  ;;  %1899 = vmatmul.mubr.f32.vlgmr.msra.gmra.mrb[10].mxu0 %v2437_v20 }
 0x489   :  { %2309 = vmatpush3.bf16.msra.mxu0 %v2494_v5  ;;  %1933 = vmatprep.mubr.msk.f32.mxu0 %vm2455_vm0, %v2456_v4 }
 0x48a   :  { %v660_v24 = vadd.f32 %v1482_v22, %v2773_v29  ;;  %2310 = vmatprep.subr.bf16.mxu0 %v2454_v0 }
 0x48c   :  { %2438 = vtanh.f32 %v660_v24 }
 0x48d   :  { %2312 = vmatpush3.bf16.msra.mxu0 %v2501_v7 }
 0x48e   :  { %2313 = vmatprep.subr.bf16.mxu0 %v2454_v0 }
 0x491   :  { %2315 = vmatpush3.bf16.msra.mxu0 %v2531_v17 }
 0x492   :  { %2316 = vmatprep.subr.bf16.mxu0 %v2454_v0 }
 0x495   :  { %2318 = vmatpush3.bf16.msra.mxu0 %v2570_v30 }
 0x496   :  { %v2439_v25 = vpop.eup %2438  ;;  %2319 = vmatprep.subr.bf16.mxu0 %v2454_v0 }
 0x497   :  { %1266 = vst [vmem:[%s3013_s4 + $0x18] sm:$0xff] %v2439_v25  ;;  %804 = vmatprep.mubr.f32.mxu1 %v2439_v25 }
 0x498   :  { %805 = vmatmul.mubr.f32.vlgmr.msra.gmra.mrb[8].mxu1 %v2437_v20 }
 0x499   :  { %2321 = vmatpush3.bf16.msra.mxu0 %v2598_v39  ;;  %2278 = vmatpush3.bf16.msra.mxu1 %v2533_v18 }
 0x49a   :  { %2322 = vmatprep.subr.bf16.mxu0 %v2454_v0  ;;  %2280 = vmatprep.subr.bf16.mxu1 %v2549_v23 }
 0x49d   :  { %2324 = vmatpush3.bf16.msra.mxu0 %v2626_v48  ;;  %2282 = vmatpush3.bf16.msra.mxu1 %v2558_v26 }
 0x49e   :  { %2325 = vmatprep.subr.bf16.mxu0 %v2454_v0  ;;  %2284 = vmatprep.subr.bf16.mxu1 %v2561_v27 }
 0x4a1   :  { %2327 = vmatpush3.bf16.msra.mxu0 %v2640_v52  ;;  %2286 = vmatpush3.bf16.msra.mxu1 %v2586_v35 }
 0x4a2   :  { %2328 = vmatprep.subr.bf16.mxu0 %v2454_v0  ;;  %2288 = vmatprep.subr.bf16.mxu1 %v2589_v36 }
 0x4a5   :  { %2330 = vmatpush3.bf16.msra.mxu0 %v2651_v55  ;;  %2290 = vmatpush3.bf16.msra.mxu1 %v2614_v44 }
 0x4a6   :  { %2292 = vmatprep.subr.bf16.mxu1 %v2617_v45  ;;  %2363 = vmatprep.subr.bf16.mxu0 %v2454_v0 }
 0x4a9   :  { %2294 = vmatpush3.bf16.msra.mxu1 %v2636_v51 }
 0x4aa   :  { %2296 = vmatprep.subr.bf16.mxu1 %v2681_v58 }
 0x4ad   :  { %2298 = vmatpush3.bf16.msra.mxu1 %v2689_v61 }
 0x4ae   :  { %2300 = vmatprep.subr.bf16.mxu1 %v2702_v2 }
 0x4b1   :  { %2302 = vmatpush3.bf16.msra.mxu1 %v2713_v9 }
 0x4b2   :  { %2304 = vmatprep.subr.bf16.mxu1 %v2715_v10 }
 0x4b5   :  { %2306 = vmatpush3.bf16.msra.mxu1 %v2725_v14 }
 0x4b6   :  { %2332 = vmatprep.subr.bf16.mxu1 %v2519_v13 }
 0x55b   :  { %v881_v31 = vpop.f32.mrb[10].mxu0 }
 0x55c   :  { %v885_v32 = vadd.f32 %v1269_v28, %v881_v31  ;;  %v1900_v33 = vpop.f32.mrb[11].mxu0 }
 0x55e   :  { %2440 = vtanh.f32 %v885_v32 }
 0x568   :  { %v2441_v34 = vpop.eup %2440 }
 0x569   :  { %1934 = vmatmul.mubr.f32.vlgmr.msra.gmra.mrb[12].mxu0 %v2441_v34 }
 0x56a   :  { %2365 = vmatpush3.bf16.msra.mxu0 %v2494_v5  ;;  %1968 = vmatprep.mubr.msk.f32.mxu0 %vm2455_vm0, %v2456_v4 }
 0x56b   :  { %v1532_v37 = vpop.f32.mrb[8].mxu1  ;;  %2366 = vmatprep.subr.bf16.mxu0 %v2454_v0 }
 0x56c   :  { %v1533_v38 = vpop.f32.mrb[9].mxu1 }
 0x56d   :  { %v1534_v40 = vadd.f32 %v1533_v38, %v1532_v37 }
 0x56e   :  { %2368 = vmatpush3.bf16.msra.mxu0 %v2501_v7 }
 0x56f   :  { %v807_v41 = vadd.f32 %v1534_v40, %v2773_v29  ;;  %2369 = vmatprep.subr.bf16.mxu0 %v2454_v0 }
 0x571   :  { %2442 = vtanh.f32 %v807_v41 }
 0x572   :  { %2371 = vmatpush3.bf16.msra.mxu0 %v2531_v17 }
 0x573   :  { %2372 = vmatprep.subr.bf16.mxu0 %v2454_v0 }
 0x576   :  { %2374 = vmatpush3.bf16.msra.mxu0 %v2570_v30 }
 0x577   :  { %2375 = vmatprep.subr.bf16.mxu0 %v2454_v0 }
 0x57a   :  { %2377 = vmatpush3.bf16.msra.mxu0 %v2598_v39 }
 0x57b   :  { %v2443_v4 = vpop.eup %2442  ;;  %2378 = vmatprep.subr.bf16.mxu0 %v2454_v0 }
 0x57c   :  { %1268 = vst [vmem:[%s3013_s4 + $0x20] sm:$0xff] %v2443_v4  ;;  %951 = vmatprep.mubr.f32.mxu1 %v2443_v4 }
 0x57d   :  { %952 = vmatmul.mubr.f32.vlgmr.msra.gmra.mrb[10].mxu1 %v2441_v34 }
 0x57e   :  { %2380 = vmatpush3.bf16.msra.mxu0 %v2626_v48  ;;  %2334 = vmatpush3.bf16.msra.mxu1 %v2533_v18 }
 0x57f   :  { %2381 = vmatprep.subr.bf16.mxu0 %v2454_v0  ;;  %2336 = vmatprep.subr.bf16.mxu1 %v2549_v23 }
 0x582   :  { %2383 = vmatpush3.bf16.msra.mxu0 %v2640_v52  ;;  %2338 = vmatpush3.bf16.msra.mxu1 %v2558_v26 }
 0x583   :  { %2384 = vmatprep.subr.bf16.mxu0 %v2454_v0  ;;  %2340 = vmatprep.subr.bf16.mxu1 %v2561_v27  ;;  %v1271_v0 = vld [vmem:[%s3011_s0 + $0x30] sm:$0xff] }
 0x586   :  { %2386 = vmatpush3.bf16.msra.mxu0 %v2651_v55  ;;  %2342 = vmatpush3.bf16.msra.mxu1 %v2586_v35 }
 0x587   :  { %2344 = vmatprep.subr.bf16.mxu1 %v2589_v36 }
 0x58a   :  { %2346 = vmatpush3.bf16.msra.mxu1 %v2614_v44 }
 0x58b   :  { %2348 = vmatprep.subr.bf16.mxu1 %v2617_v45 }
 0x58e   :  { %2350 = vmatpush3.bf16.msra.mxu1 %v2636_v51 }
 0x58f   :  { %2352 = vmatprep.subr.bf16.mxu1 %v2681_v58 }
 0x592   :  { %2354 = vmatpush3.bf16.msra.mxu1 %v2689_v61 }
 0x593   :  { %2356 = vmatprep.subr.bf16.mxu1 %v2702_v2 }
 0x596   :  { %2358 = vmatpush3.bf16.msra.mxu1 %v2713_v9 }
 0x597   :  { %2360 = vmatprep.subr.bf16.mxu1 %v2715_v10 }
 0x59a   :  { %2362 = vmatpush3.bf16.msra.mxu1 %v2725_v14 }
 0x59b   :  { %2388 = vmatprep.subr.bf16.mxu1 %v2519_v13 }
 0x63c   :  { %v1028_v5 = vpop.f32.mrb[12].mxu0 }
 0x63d   :  { %v1032_v7 = vadd.f32 %v1271_v0, %v1028_v5  ;;  %v1935_v17 = vpop.f32.mrb[13].mxu0 }
 0x63f   :  { %2444 = vtanh.f32 %v1032_v7 }
 0x649   :  { %v2445_v30 = vpop.eup %2444 }
 0x64a   :  { %1969 = vmatmul.mubr.f32.vlgmr.msra.gmra.mrb[14].mxu0 %v2445_v30 }
 0x650   :  { %v1584_v39 = vpop.f32.mrb[10].mxu1 }
 0x651   :  { %v1585_v48 = vpop.f32.mrb[11].mxu1 }
 0x652   :  { %v1586_v52 = vadd.f32 %v1585_v48, %v1584_v39 }
 0x654   :  { %v954_v55 = vadd.f32 %v1586_v52, %v2773_v29 }
 0x656   :  { %2446 = vtanh.f32 %v954_v55 }
 0x660   :  { %v2447_v42 = vpop.eup %2446 }
 0x661   :  { %1270 = vst [vmem:[%s3013_s4 + $0x28] sm:$0xff] %v2447_v42  ;;  %1098 = vmatprep.mubr.f32.mxu1 %v2447_v42 }
 0x662   :  { %1099 = vmatmul.mubr.f32.vlgmr.msra.gmra.mrb[12].mxu1 %v2445_v30 }
 0x663   :  { %2390 = vmatpush3.bf16.msra.mxu1 %v2533_v18 }
 0x664   :  { %2392 = vmatprep.subr.bf16.mxu1 %v2549_v23  ;;  %v1273_v23 = vld [vmem:[%s3011_s0 + $0x38] sm:$0xff] }
 0x667   :  { %2394 = vmatpush3.bf16.msra.mxu1 %v2558_v26 }
 0x668   :  { %2396 = vmatprep.subr.bf16.mxu1 %v2561_v27 }
 0x66b   :  { %2398 = vmatpush3.bf16.msra.mxu1 %v2586_v35 }
 0x66c   :  { %2400 = vmatprep.subr.bf16.mxu1 %v2589_v36 }
 0x66f   :  { %2402 = vmatpush3.bf16.msra.mxu1 %v2614_v44 }
 0x670   :  { %2404 = vmatprep.subr.bf16.mxu1 %v2617_v45 }
 0x673   :  { %2406 = vmatpush3.bf16.msra.mxu1 %v2636_v51 }
 0x674   :  { %2408 = vmatprep.subr.bf16.mxu1 %v2681_v58 }
 0x677   :  { %2410 = vmatpush3.bf16.msra.mxu1 %v2689_v61 }
 0x678   :  { %2412 = vmatprep.subr.bf16.mxu1 %v2702_v2 }
 0x67b   :  { %2414 = vmatpush3.bf16.msra.mxu1 %v2713_v9 }
 0x67c   :  { %2416 = vmatprep.subr.bf16.mxu1 %v2715_v10 }
 0x67f   :  { %2418 = vmatpush3.bf16.msra.mxu1 %v2725_v14 }
 0x71d   :  { %v1175_v13 = vpop.f32.mrb[14].mxu0 }
 0x71e   :  { %v1970_v18 = vpop.f32.mrb[15].mxu0  ;;  %v1179_v36 = vadd.f32 %v1273_v23, %v1175_v13 }
 0x735   :  { %v1636_v26 = vpop.f32.mrb[12].mxu1 }
 0x736   :  { %v1637_v27 = vpop.f32.mrb[13].mxu1 }
 0x737   :  { %v1638_v35 = vadd.f32 %v1637_v27, %v1636_v26 }
 0x739   :  { %v1101_v44 = vadd.f32 %v1638_v35, %v2773_v29 }
 0x73b   :  { %2448 = vtanh.f32 %v1101_v44 }
 0x73c   :  { %2450 = vtanh.f32 %v1179_v36 }
 0x745   :  { %v2449_v45 = vpop.eup %2448 }
 0x746   :  { %v2451_v51 = vpop.eup %2450  ;;  %1272 = vst [vmem:[%s3013_s4 + $0x30] sm:$0xff] %v2449_v45  ;;  %1245 = vmatprep.mubr.f32.mxu1 %v2449_v45 }
 0x747   :  { %1246 = vmatmul.mubr.f32.vlgmr.msra.gmra.mrb[14].mxu1 %v2451_v51 }
 0x81a   :  { %v1688_v58 = vpop.f32.mrb[14].mxu1 }
 0x81b   :  { %v1689_v61 = vpop.f32.mrb[15].mxu1 }
 0x81c   :  { %v1690_v2 = vadd.f32 %v1689_v61, %v1688_v58 }
 0x81e   :  { %v1248_v9 = vadd.f32 %v1690_v2, %v2773_v29 }
 0x820   :  { %2452 = vtanh.f32 %v1248_v9 }
 0x82a   :  { %v2453_v10 = vpop.eup %2452 }
 0x82b   :  { %1274 = vst [vmem:[%s3013_s4 + $0x38] sm:$0xff] %v2453_v10 }

</bundles_post_ra>
